<compile_context>
chip_gen: v5e
topology: v5e:2x2
jax: 0.10.0
libtpu: 0.0.40
codegen_flags: <defaults>
</compile_context>

<pallas_src>
import functools
import math

import numpy as np
import jax
import jax.numpy as jnp
from jax.experimental import pallas as pl
from jax.experimental.pallas import tpu as pltpu


# ------------------------------------------------------------------ hw-aware budgets

def _tpu_vmem_capacity():
    try:
        info = pltpu.get_tpu_info()
        cap = getattr(info, "vmem_capacity_bytes", None)
        if cap:
            return int(cap)
    except Exception:
        pass
    return 64 * 1024 * 1024          # conservative (v7x-sized) fallback


_VMEM_CAP = _tpu_vmem_capacity()
# explicit scoped-VMEM budget, re-derived per generation (headroom for compiler scratch)
_VMEM_BUDGET = int(min(_VMEM_CAP - 16 * 1024 * 1024, 96 * 1024 * 1024))
_ATTN_GROUP_BUDGET = _VMEM_BUDGET // 2
# bigger linear tiles where VMEM is plentiful (v5e/v6e: 128 MiB), smaller on v7x (64 MiB)
if _VMEM_CAP >= 96 * 1024 * 1024:
    _LIN_TM, _LIN_TN, _LIN_TK = 512, 512, 1024
else:
    _LIN_TM, _LIN_TN, _LIN_TK = 256, 256, 512


# ------------------------------------------------------------------ helpers

def _round_up(x, m):
    return ((x + m - 1) // m) * m


def _pick_tile(d, target, align):
    """Pick a tile (multiple of `align`, <= max(target, padded dim)) that exactly
    divides the padded dim.  Returns (tile, padded_dim)."""
    dp = _round_up(d, align)
    if dp <= target:
        return dp, dp
    t = (target // align) * align
    while t > align and dp % t != 0:
        t -= align
    return t, dp


def _pick_group_tile(G, Lq, Lk, D, budget_bytes):
    """Group-block size (multiple of 8) so double-buffered bf16 q/k/v tiles + f32
    score/prob temporaries fit the VMEM budget.  Returns (Gt, padded_G)."""
    gp8 = _round_up(G, 8)
    per_g = (2 * (Lq + 2 * Lk) * D * 2          # double-buffered bf16 q/k/v tiles
             + 2 * Lq * Lk * 4                  # f32 score / prob temporaries
             + 2 * (Lq + Lk) * 4                # masks (double-buffered)
             + 2 * D * 4)                       # output tile
    gt = max(8, (budget_bytes // max(per_g, 1)) // 8 * 8)
    gt = min(gt, gp8)
    gp = _round_up(G, gt)
    return gt, gp


# ------------------------------------------------------------------ tiled linear kernel

def _linear_kernel(x_ref, w_ref, b_ref, o_ref, acc_ref):
    @pl.when(pl.program_id(2) == 0)
    def _():
        acc_ref[...] = jnp.zeros_like(acc_ref)

    # bf16 @ bf16 on the MXU, f32 accumulation
    acc_ref[...] += jnp.dot(x_ref[...], w_ref[...],
                            preferred_element_type=jnp.float32)

    @pl.when(pl.program_id(2) == pl.num_programs(2) - 1)
    def _():
        o_ref[...] = (acc_ref[...] + b_ref[...]).astype(o_ref.dtype)


class PaddedLinear:
    """y = x @ W + b.  W/b are padded to tile-aligned shapes and cast to bf16 ONCE at
    construction; each call only pads/casts x.  f32 accumulation and f32 output."""

    def __init__(self, w, b, *, tm=_LIN_TM, tn=_LIN_TN, tk=_LIN_TK):
        K, N = w.shape
        self.K, self.N = K, N
        self.tm_target = tm
        self.tk, self.Kp = _pick_tile(K, tk, 128)
        self.tn, self.Np = _pick_tile(N, tn, 128)
        wp = w if (self.Kp, self.Np) == (K, N) else jnp.pad(
            w, ((0, self.Kp - K), (0, self.Np - N)))
        self.wp = wp.astype(jnp.bfloat16)                         # bf16 MXU operand
        bp = b if self.Np == N else jnp.pad(b, (0, self.Np - N))
        self.bp = bp.reshape(1, self.Np).astype(jnp.float32)      # bias stays f32

    def __call__(self, x):
        M, K = x.shape
        assert K == self.K
        tm, Mp = _pick_tile(M, self.tm_target, 16)                # 16: bf16 sublane packing
        xp = x.astype(jnp.bfloat16)
        if (Mp, self.Kp) != (M, K):
            xp = jnp.pad(xp, ((0, Mp - M), (0, self.Kp - K)))
        out = pl.pallas_call(
            _linear_kernel,
            out_shape=jax.ShapeDtypeStruct((Mp, self.Np), jnp.float32),
            grid=(Mp // tm, self.Np // self.tn, self.Kp // self.tk),   # K innermost
            in_specs=[
                pl.BlockSpec((tm, self.tk), lambda i, j, k: (i, k)),
                pl.BlockSpec((self.tk, self.tn), lambda i, j, k: (k, j)),
                pl.BlockSpec((1, self.tn), lambda i, j, k: (0, j)),
            ],
            out_specs=pl.BlockSpec((tm, self.tn), lambda i, j, k: (i, j)),
            scratch_shapes=[pltpu.VMEM((tm, self.tn), jnp.float32)],
            compiler_params=pltpu.CompilerParams(
                dimension_semantics=("parallel", "parallel", "arbitrary"),
                vmem_limit_bytes=_VMEM_BUDGET,
            ),
        )(xp, self.wp, self.bp)
        if (Mp, self.Np) != (M, self.N):
            out = out[:M, :self.N]
        return out


# ------------------------------------------------------------------ batched attention kernels
# Each grid step processes one batch element and one block of Gt (slice, head) groups:
#   out[g, :] = sum_q softmax(q[g] k[g]^T * scale) v[g]        (keepdim query sum)
# The query-sum is folded into the probabilities: pr = sum_q p, out = pr @ v.

def _attn_sum_kernel(q_ref, k_ref, v_ref, o_ref, *, scale):
    s = jnp.einsum('gqd,gkd->gqk', q_ref[...], k_ref[...],
                   preferred_element_type=jnp.float32) * scale       # f32 scores, scale in f32
    s = s - jnp.max(s, axis=-1, keepdims=True)
    p = jnp.exp(s)
    p = p * pl.reciprocal(jnp.sum(p, axis=-1, keepdims=True), approx=False)
    pr = jnp.sum(p, axis=1, keepdims=True)                           # (Gt, 1, Lk)
    o = jnp.einsum('gqk,gkd->gqd', pr.astype(jnp.bfloat16), v_ref[...],
                   preferred_element_type=jnp.float32)               # (Gt, 1, D)
    o_ref[...] = o[:, 0, :].astype(o_ref.dtype)                      # (Gt, D)


def _attn_sum_masked_kernel(q_ref, k_ref, v_ref, km_ref, qm_ref, o_ref, *, scale):
    s = jnp.einsum('gqd,gkd->gqk', q_ref[...], k_ref[...],
                   preferred_element_type=jnp.float32) * scale       # (Gt, Lq, Lk) f32
    s = s + km_ref[...]                                              # additive: 0 valid / -1e30 pad (f32)
    s = s - jnp.max(s, axis=-1, keepdims=True)
    p = jnp.exp(s)
    p = p * pl.reciprocal(jnp.sum(p, axis=-1, keepdims=True), approx=False)
    p = p * qm_ref[...]                                              # zero padded query rows (f32)
    pr = jnp.sum(p, axis=1, keepdims=True)                           # (Gt, 1, Lk)
    o = jnp.einsum('gqk,gkd->gqd', pr.astype(jnp.bfloat16), v_ref[...],
                   preferred_element_type=jnp.float32)               # (Gt, 1, D)
    o_ref[...] = o[:, 0, :].astype(o_ref.dtype)                      # (Gt, D)


def attention_sum_pallas(q, k, v, scale, *, kmask=None, qmask=None):
    """q: (B, G, Lq, D); k, v: (B, G, Lk, D)  ->  (B, G, D) f32.

    Grid is (batch, group-blocks); q/k/v are fed to the MXU in bf16; optional
    kmask (G,1,Lk) additive / qmask (G,Lq,1) multiplicative f32 masks handle ragged
    (padded) slices so a single kernel shape covers every slice."""
    B, G, Lq, D = q.shape
    Lk = k.shape[2]
    qb = q.astype(jnp.bfloat16)
    kb = k.astype(jnp.bfloat16)
    vb = v.astype(jnp.bfloat16)

    Gt, Gp = _pick_group_tile(G, Lq, Lk, D, _ATTN_GROUP_BUDGET)
    if Gp != G:
        pad4 = ((0, 0), (0, Gp - G), (0, 0), (0, 0))
        qb = jnp.pad(qb, pad4)
        kb = jnp.pad(kb, pad4)
        vb = jnp.pad(vb, pad4)
        if kmask is not None:
            kmask = jnp.pad(kmask, ((0, Gp - G), (0, 0), (0, 0)))
            qmask = jnp.pad(qmask, ((0, Gp - G), (0, 0), (0, 0)))

    in_specs = [
        pl.BlockSpec((None, Gt, Lq, D), lambda b, g: (b, g, 0, 0)),
        pl.BlockSpec((None, Gt, Lk, D), lambda b, g: (b, g, 0, 0)),
        pl.BlockSpec((None, Gt, Lk, D), lambda b, g: (b, g, 0, 0)),
    ]
    args = [qb, kb, vb]
    if kmask is not None:
        in_specs += [
            pl.BlockSpec((Gt, 1, Lk), lambda b, g: (g, 0, 0)),
            pl.BlockSpec((Gt, Lq, 1), lambda b, g: (g, 0, 0)),
        ]
        args += [kmask, qmask]
        kernel = functools.partial(_attn_sum_masked_kernel, scale=scale)
    else:
        kernel = functools.partial(_attn_sum_kernel, scale=scale)

    out = pl.pallas_call(
        kernel,
        out_shape=jax.ShapeDtypeStruct((B, Gp, D), jnp.float32),
        grid=(B, Gp // Gt),
        in_specs=in_specs,
        out_specs=pl.BlockSpec((None, Gt, D), lambda b, g: (b, g, 0)),
        compiler_params=pltpu.CompilerParams(
            dimension_semantics=("parallel", "parallel"),
            vmem_limit_bytes=_VMEM_BUDGET,
        ),
    )(*args)
    return out[:, :G] if Gp != G else out


# ------------------------------------------------------------------ plain-JAX glue

def rope_rotate(t, rot_dim, theta=10000.0):
    """rotary_embedding_torch.rotate_queries_or_keys semantics (interleaved pairs),
    positions along axis -2, rotating the first `rot_dim` features of the last axis."""
    L = t.shape[-2]
    inv_freq = 1.0 / (theta ** (jnp.arange(0, rot_dim, 2, dtype=jnp.float32) / rot_dim))
    freqs = jnp.arange(L, dtype=jnp.float32)[:, None] * inv_freq[None, :]
    freqs = jnp.repeat(freqs, 2, axis=-1)                                   # (L, rot_dim)
    cos = jnp.cos(freqs)[None, None]
    sin = jnp.sin(freqs)[None, None]
    t_rot, t_pass = t[..., :rot_dim], t[..., rot_dim:]
    x1 = t_rot[..., 0::2]
    x2 = t_rot[..., 1::2]
    rot_half = jnp.stack([-x2, x1], axis=-1).reshape(t_rot.shape)
    t_rot = t_rot * cos + rot_half * sin
    return jnp.concatenate([t_rot, t_pass], axis=-1)


class DividedSpaceTimeAttentionPallas:
    def __init__(self, num_heads, dim, n, num_frames, key):
        self.num_heads = num_heads
        self.dim = dim
        self.n = int(n)
        self.num_frames = num_frames
        self.Dh = int(dim / num_heads)
        # pos_emb assumed RotaryEmbedding(dim=Dh): rotate first Dh of the 3*Dh head features.
        self.rot_dim = self.Dh
        P = 3 * self.Dh * num_heads                   # per-projection width (== 3*dim)
        self.P = P

        ks = jax.random.split(key, 10)
        w = lambda k, shape: 0.02 * jax.random.normal(k, shape, jnp.float32)
        # stored as (in_features, out_features)
        Wq, bq = w(ks[0], (dim, P)), w(ks[1], (P,))
        Wk, bk = w(ks[2], (dim, P)), w(ks[3], (P,))
        Wv, bv = w(ks[4], (dim, P)), w(ks[5], (P,))
        Wt, bt = w(ks[6], (P, dim)), w(ks[7], (dim,))       # multimad_temp
        Wf, bf = w(ks[8], (P, dim)), w(ks[9], (dim,))       # multi_mad_final
        # fused q|k|v weights: one linear launch instead of three (padded/bf16 once)
        self.lin_qkv = PaddedLinear(jnp.concatenate([Wq, Wk, Wv], axis=1),
                                    jnp.concatenate([bq, bk, bv], axis=0))
        self.lin_temp = PaddedLinear(Wt, bt)
        self.lin_final = PaddedLinear(Wf, bf)

        # ---- static stage-2 gather indices + masks (built once).  Token t of the
        # F-times repeated sequence maps to base index t % (n-1); ragged key slices
        # share one padded shape via additive key / multiplicative query masks.
        n_, F, H = self.n, num_frames, num_heads
        T2 = (n_ - 1) * F
        q_rows = [list(range(0, min(n_, T2)))]
        k_rows = [list(range(0, min(n_, T2)))]
        for xi in range(1, F):
            q_rows.append(list(range(xi, min(xi + n_, T2))))
            k_rows.append(list(range(xi, T2, n_)))
        S2 = F
        self.s2_Lq = max(len(r) for r in q_rows)
        self.s2_Lk = max(len(r) for r in k_rows)

        def pad_rows(rows, L):
            idx = np.zeros((S2, L), dtype=np.int32)
            msk = np.zeros((S2, L), dtype=np.float32)
            for s, r in enumerate(rows):
                idx[s, :len(r)] = r
                msk[s, :len(r)] = 1.0
            return idx, msk

        qi_np, qm_np = pad_rows(q_rows, self.s2_Lq)
        ki_np, km_np = pad_rows(k_rows, self.s2_Lk)
        self.s2_qi = jnp.asarray(qi_np % (n_ - 1))           # virtual-repeat -> base token
        self.s2_ki = jnp.asarray(ki_np % (n_ - 1))
        qmask = jnp.repeat(jnp.asarray(qm_np)[:, None, :, None], H, axis=1)
        self.s2_qmask = qmask.reshape(S2 * H, self.s2_Lq, 1)            # multiplicative (f32)
        kmask = jnp.repeat(jnp.asarray((1.0 - km_np) * -1e30)[:, None, None, :], H, axis=1)
        self.s2_kmask = kmask.reshape(S2 * H, 1, self.s2_Lk)            # additive (f32)

    # nn.Linear applied token-wise through the tiled Pallas linear kernel
    def _proj(self, x, lin):
        B, T, K = x.shape
        return lin(x.reshape(B * T, K)).reshape(B, T, lin.N)

    def _qkv(self, x):
        """Fused q/k/v projection (one launch). Returns (Q, K, V), each (B, T, P)."""
        B, T, K = x.shape
        y = self.lin_qkv(x.reshape(B * T, K)).reshape(B, T, 3 * self.P)
        return y[..., :self.P], y[..., self.P:2 * self.P], y[..., 2 * self.P:]

    def _to_heads(self, y):   # 'b t (h d) -> b h t d'
        B, T, _ = y.shape
        return y.reshape(B, T, self.num_heads, 3 * self.Dh).transpose(0, 2, 1, 3)

    def __call__(self, x):
        B, N, dim = x.shape
        n, F, H, Dp = self.n, self.num_frames, self.num_heads, 3 * self.Dh
        # matches torch: scores / (sqrt(Dh) * num_heads)
        scale = 1.0 / (math.sqrt(self.Dh) * H)

        # ---- fused q/k/v projection of the whole input (CLS + patches): one launch.
        Q, K, V = self._qkv(x)                                   # each (B, N, P)

        # q/k/v cross-wiring exactly as in the torch module (self.v -> k_mat, self.k -> v_mat)
        q_mat = self._to_heads(Q[:, 1:])                         # (B, H, F*n, Dp)
        k_mat = self._to_heads(V[:, 1:])
        v_mat = self._to_heads(K[:, 1:])
        q_mat = rope_rotate(q_mat, self.rot_dim)
        k_mat = rope_rotate(k_mat, self.rot_dim)

        q_cls = self._to_heads(Q[:, 0:1])                        # (B, H, 1, Dp)
        v_cls = self._to_heads(V)                                # (B, H, N, Dp)
        k_cls = self._to_heads(K)

        # CLS attention (Lq == 1, so the keepdim query-sum is a no-op): (B, H, Dp)
        inter_cls = attention_sum_pallas(q_cls, k_cls, v_cls, scale)
        inter_cls = inter_cls.reshape(B, 1, H * Dp)              # 'b h 1 d -> b 1 (h d)'

        # ---- stage 1: temporal attention.  All strided slices xi::n (xi = 1..n-1) are
        # gathered with ONE reshape/transpose and processed in a single batched launch.
        def frame_major(t):   # (B, H, F*n, Dp) -> (B, n, H, F, Dp)  (axis 1 == stride offset)
            return t.reshape(B, H, F, n, Dp).transpose(0, 3, 1, 2, 4)

        q_s1 = frame_major(q_mat)[:, 1:].reshape(B, (n - 1) * H, F, Dp)
        k_s1 = frame_major(k_mat)[:, 1:].reshape(B, (n - 1) * H, F, Dp)
        v_s1 = frame_major(v_mat)[:, 1:].reshape(B, (n - 1) * H, F, Dp)
        temporal1 = attention_sum_pallas(q_s1, k_s1, v_s1, scale)   # (B, (n-1)*H, Dp)
        temporal1 = temporal1.reshape(B, n - 1, H * Dp)             # heads minor -> free reshape

        # torch: temporal.repeat(1,1,F,1) then Linear.  The Linear is token-wise, so we
        # project the (n-1)-token base once and index the (virtual) repeats instead.
        ti_base = self._proj(temporal1, self.lin_temp)              # (B, n-1, dim)

        Q2, K2, V2 = self._qkv(ti_base)                             # fused, one launch
        q2 = self._to_heads(Q2)                                     # (B, H, n-1, Dp)
        v2 = self._to_heads(K2)                                     # cross-wired as in torch
        k2 = self._to_heads(V2)

        # ---- stage 2: one batched launch over all F padded slices (static masks).
        S2 = F

        def gather2(t, idx):   # (B, H, n-1, Dp), (S2, L) -> (B, S2*H, L, Dp)
            g = t[:, :, idx, :]                          # (B, H, S2, L, Dp)
            return g.transpose(0, 2, 1, 3, 4).reshape(B, S2 * H, idx.shape[1], Dp)

        q_s2 = gather2(q2, self.s2_qi)
        k_s2 = gather2(k2, self.s2_ki)
        v_s2 = gather2(v2, self.s2_ki)
        temporal2 = attention_sum_pallas(q_s2, k_s2, v_s2, scale,
                                         kmask=self.s2_kmask,
                                         qmask=self.s2_qmask)        # (B, F*H, Dp)
        temporal2 = temporal2.reshape(B, F, H * Dp)

        # torch: temporal.repeat(1,1,n,1); cat(cls, temporal); final Linear.
        # Final Linear is token-wise -> project the (1+F)-token base and replicate the
        # projected frame block n times afterwards (no big tile materialised).
        base = jnp.concatenate([inter_cls, temporal2], axis=1)       # (B, 1+F, H*Dp)
        y = self._proj(base, self.lin_final)                         # (B, 1+F, dim)
        out = jnp.concatenate([y[:, :1], jnp.tile(y[:, 1:], (1, n, 1))], axis=1)
        return out                                                    # (B, N, dim)


# ------------------------------------------------------------------ demo

if __name__ == "__main__":
    num_heads = 4
    dim = 32           # Dh = 8, per-head projected dim = 3*Dh = 24
    n = 4              # patches per frame
    num_frames = 5
    batch = 2
    N = 1 + num_frames * n          # CLS + all patch tokens = 21

    key = jax.random.PRNGKey(0)
    k_param, k_x = jax.random.split(key)
    model = DividedSpaceTimeAttentionPallas(num_heads, dim, n, num_frames, k_param)

    x = jax.random.normal(k_x, (batch, N, dim), jnp.float32)
    out = jax.block_until_ready(model(x))
    assert out.shape == (batch, N, dim), out.shape
    assert bool(jnp.all(jnp.isfinite(out)))
    print("KERNEL_OK")
</pallas_src>

<mosaic_0001>
module attributes {stable_mosaic.version = 11 : i64} {
  func.func @_linear_kernel(%arg0: i32, %arg1: i32, %arg2: i32, %arg3: memref<48x128xbf16, #tpu.memory_space<vmem>>, %arg4: memref<128x128xbf16, #tpu.memory_space<vmem>>, %arg5: memref<1x128xf32, #tpu.memory_space<vmem>>, %arg6: memref<48x128xf32, #tpu.memory_space<vmem>>, %arg7: memref<48x128xf32, #tpu.memory_space<vmem>>) attributes {dimension_semantics = [#tpu.dimension_semantics<parallel>, #tpu.dimension_semantics<parallel>, #tpu.dimension_semantics<arbitrary>], iteration_bounds = array<i64: 1, 3, 1>, scalar_prefetch = 0 : i64, scratch_operands = 1 : i64, tpu.core_type = #tpu.core_type<tc>, window_params = [{transform_indices = @transform_0, window_bounds = array<i64: 48, 128>}, {transform_indices = @transform_1, window_bounds = array<i64: 128, 128>}, {transform_indices = @transform_2, window_bounds = array<i64: 1, 128>}, {transform_indices = @transform_3, window_bounds = array<i64: 48, 128>}]} {
    %c0_i32 = arith.constant 0 : i32
    %0 = arith.cmpi eq, %arg2, %c0_i32 : i32
    %1 = arith.extui %0 : i1 to i32
    %c0_i32_0 = arith.constant 0 : i32
    %2 = arith.cmpi ne, %1, %c0_i32_0 : i32
    scf.if %2 {
      %cst_10 = arith.constant 0.000000e+00 : f32
      %12 = vector.broadcast %cst_10 : f32 to vector<48x128xf32>
      %c0_11 = arith.constant 0 : index
      %c0_12 = arith.constant 0 : index
      %13 = vector.load %arg7[%c0_11, %c0_12] : memref<48x128xf32, #tpu.memory_space<vmem>>, vector<48x128xf32>
      tpu.vector_store %arg7[%c0_11, %c0_12], %12 {strides = array<i32>} : memref<48x128xf32, #tpu.memory_space<vmem>>, vector<48x128xf32>,
    } else {
    }
    %c0 = arith.constant 0 : index
    %c0_1 = arith.constant 0 : index
    %3 = vector.load %arg7[%c0, %c0_1] : memref<48x128xf32, #tpu.memory_space<vmem>>, vector<48x128xf32>
    %c0_2 = arith.constant 0 : index
    %c0_3 = arith.constant 0 : index
    %4 = vector.load %arg3[%c0_2, %c0_3] : memref<48x128xbf16, #tpu.memory_space<vmem>>, vector<48x128xbf16>
    %c0_4 = arith.constant 0 : index
    %c0_5 = arith.constant 0 : index
    %5 = vector.load %arg4[%c0_4, %c0_5] : memref<128x128xbf16, #tpu.memory_space<vmem>>, vector<128x128xbf16>
    %cst = arith.constant dense<0.000000e+00> : vector<48x128xf32>
    %6 = tpu.matmul %4, %5, %cst {dimension_numbers = #tpu.dot_dimension_numbers<[1], [0], [0], [1], [0, 0, 1, 1], [], []>} : vector<48x128xbf16>, vector<128x128xbf16>, vector<48x128xf32> -> vector<48x128xf32>
    %7 = arith.addf %3, %6 : vector<48x128xf32>
    %c0_6 = arith.constant 0 : index
    %c0_7 = arith.constant 0 : index
    %8 = vector.load %arg7[%c0_6, %c0_7] : memref<48x128xf32, #tpu.memory_space<vmem>>, vector<48x128xf32>
    tpu.vector_store %arg7[%c0_6, %c0_7], %7 {strides = array<i32>} : memref<48x128xf32, #tpu.memory_space<vmem>>, vector<48x128xf32>,
    %c0_i32_8 = arith.constant 0 : i32
    %9 = arith.cmpi eq, %arg2, %c0_i32_8 : i32
    %10 = arith.extui %9 : i1 to i32
    %c0_i32_9 = arith.constant 0 : i32
    %11 = arith.cmpi ne, %10, %c0_i32_9 : i32
    scf.if %11 {
      %c0_10 = arith.constant 0 : index
      %c0_11 = arith.constant 0 : index
      %12 = vector.load %arg7[%c0_10, %c0_11] : memref<48x128xf32, #tpu.memory_space<vmem>>, vector<48x128xf32>
      %c0_12 = arith.constant 0 : index
      %c0_13 = arith.constant 0 : index
      %13 = vector.load %arg5[%c0_12, %c0_13] : memref<1x128xf32, #tpu.memory_space<vmem>>, vector<1x128xf32>
      %14 = vector.broadcast %13 : vector<1x128xf32> to vector<48x128xf32>
      %15 = arith.addf %12, %14 : vector<48x128xf32>
      %c0_14 = arith.constant 0 : index
      %c0_15 = arith.constant 0 : index
      %16 = vector.load %arg6[%c0_14, %c0_15] : memref<48x128xf32, #tpu.memory_space<vmem>>, vector<48x128xf32>
      tpu.vector_store %arg6[%c0_14, %c0_15], %15 {strides = array<i32>} : memref<48x128xf32, #tpu.memory_space<vmem>>, vector<48x128xf32>,
    } else {
    }
    return
  }
  func.func @transform_0(%arg0: i32, %arg1: i32, %arg2: i32) -> (i32, i32) {
    %c0_i32 = arith.constant 0 : i32
    return %arg0, %arg2 : i32, i32
  }
  func.func @transform_1(%arg0: i32, %arg1: i32, %arg2: i32) -> (i32, i32) {
    %c0_i32 = arith.constant 0 : i32
    return %arg2, %arg1 : i32, i32
  }
  func.func @transform_2(%arg0: i32, %arg1: i32, %arg2: i32) -> (i32, i32) {
    %c0_i32 = arith.constant 0 : i32
    %c0_i32_0 = arith.constant 0 : i32
    return %c0_i32, %arg1 : i32, i32
  }
  func.func @transform_3(%arg0: i32, %arg1: i32, %arg2: i32) -> (i32, i32) {
    %c0_i32 = arith.constant 0 : i32
    return %arg0, %arg1 : i32, i32
  }
}

</mosaic_0001>

<bundles_post_ra>
// kernel: tpu_custom_call.1
= control target key start
LH: loop header
LB: loop body
LE: loop exit
PB: predicated region body
PF: predicated region fallthrough
CT: control target
= control target key end

     0   :  { %8 = vsyncpa [#allocation4], 0  ;;  %s1144_s0 = inlined_call_operand.hbm [shape: bf16[48,128], index: 0, kind: input, shape index: {}]   ;;  %s1145_s1 = inlined_call_operand.hbm [shape: bf16[128,384], index: 1, kind: input, shape index: {}]   ;;  %s1146_s2 = inlined_call_operand.hbm [shape: f32[1,384], index: 2, kind: input, shape index: {}]   ;;  %s1147_s3 = inlined_call_operand.hbm [shape: f32[48,384], index: 3, kind: output, shape index: {}]  }
   0x1   :  { %9 = vsyncpa [#allocation7], 0 }
   0x2   :  { %11 = vsyncpa [#allocation7 + $0x1], 0 }
   0x3   :  { %12 = vsyncpa [#allocation5], 0 }
   0x4   :  { %14 = vsyncpa [#allocation5 + $0x1], 0  ;;  %s957_s12 = smov 0   ;;  %s959_s13 = smov 0  }
   0x5   :  { %s961_s14 = smov 0   ;;  %s963_s15 = smov 0  }
   0x6   :  { %s965_s16 = smov 0   ;;  %s967_s17 = smov 0  }
   0x7 LB: > { %s35_s18 = sadd.s32 1, %s924_s16  ;;  %s76_s19 = sadd.s32 1, %s916_s14  ;;  %s928_s17 = sphi %s967_s17, %s20_s17   ;;  %s924_s16 = sphi %s965_s16, %s1158_s16   ;;  %s920_s15 = sphi %s963_s15, %s1157_s15   ;;  %s916_s14 = sphi %s961_s14, %s1156_s14   ;;  %s912_s13 = sphi %s959_s13, %s1155_s13   ;;  %s908_s12 = sphi %s957_s12, %s1154_s12  }
   0x8   : > { %p37_p0 = scmp.ge.s32.totalorder %s35_s18, 3  ;;  %p83_p1 = scmp.ne.s32.totalorder %s916_s14, %s912_s13 }
   0x9   : > { %p84_p2 = scmp.eq.s32.totalorder %s928_s17, 0  ;;  %p693_p5 = scmp.lt.s32.totalorder %s928_s17, 3 }
   0xa   : > { %s1160_s18 = smov (%p37_p0, %s35_s18), 0  ;;  %s185_s22 = sand.u32 1, %s928_s17  }
   0xb   : > { %p997_p3 = por %p84_p2, %p83_p1  ;;  %s72_s21 = ssub.s32 %s924_s16, %s1160_s18 }
   0xc   : > { %p74_p4 = scmp.eq.s32.totalorder %s72_s21, 0  ;;  %s187_s23 = sand.u32 1, %s916_s14  }
   0xd   : > { %s587_s25 = sshll.u32 %s187_s23, 6  ;;  %s588_s26 = sshll.u32 %s924_s16, 2 }
   0xe   : > { %s1007_s24 = scalar_select %p74_p4, %s916_s14, %s76_s19  }
   0xf   : > { %s196_s29 = scalar_lea.hbm %s1145_s1, %s588_s26  ;;  %s189_s30 = scalar_lea.vmem [#allocation6], %s587_s25 }
  0x10   : > { %s199_s4 = sshll.u32 %s189_s30, 4  ;;  %s197_s5 = sshll.u32 %s196_s29, 4  ;;  %s200_s4 = int_to_ptr.vmem [resolvable:$true] %s199_s4  ;;  %s198_s5 = int_to_ptr.hbm [resolvable:$true] %s197_s5 }
  0x11   : > { %p1017_p6 = pnand %p693_p5, %p997_p3  ;;  %s1021_s7 = scalar_lea.sflag [#allocation7], %s185_s22 }
  0x12   : > { %s930_s8 = smov 192   ;;  %s931_s9 = smov 64  }
  0x13   : > { %s932_s10 = smov 4   ;;  %s1029_s11 = sadd.s32 4294967295, %s928_s17  }
  0x14   : > { %684 = dma.hbm_to_vmem [thread:$0]  (!%p1017_p6), %s198_s5, 1024, %s200_s4, %s1021_s7, %s930_s8, %s931_s9, %s932_s10  }
  0x15   : > { %s583_s19 = sadd.s32 4294967294, %s928_s17   ;;  %p89_p7 = scmp.ne.s32.totalorder %s912_s13, %s908_s12 }
  0x16   : > { %p90_p8 = scmp.eq.s32.totalorder %s1029_s11, 0  ;;  %p141_p9 = scmp.eq.s32.totalorder %s1029_s11, 2 }
  0x17   : > { %p147_p10 = scmp.eq.s32.totalorder %s583_s19, 2  ;;  %p584_p12 = scmp.ge.s32.totalorder %s928_s17, 1 }
  0x18   : > { %p1038_p11 = por %p90_p8, %p89_p7  ;;  %p1046_p13 = por %p141_p9, %p83_p1 }
  0x19   : > { %p1050_p0 = por %p147_p10, %p89_p7  ;;  %p154_p2 = scmp.lt.s32.totalorder %s928_s17, 4 }
  0x1a   : > { %s169_s27 = sshll.u32 %s1144_s0, 4  ;;  %s933_s29 = smov [#allocation3]   ;;  %s170_s27 = int_to_ptr.hbm [resolvable:$true] %s169_s27 }
  0x1b   : > { %p1058_p3 = pnand %p584_p12, %p154_p2  ;;  %s171_s30 = sshll.u32 %s933_s29, 4  ;;  %s172_s30 = int_to_ptr.vmem [resolvable:$true] %s171_s30 }
  0x1c   : > { %s215_s8 = scalar_lea.hbm %s1146_s2, %s924_s16  ;;  %s212_s19 = scalar_lea.vmem [#allocation8], %s187_s23 }
  0x1d   : > { %p677_p1 = pneg %p1058_p3  ;;  %s219_s25 = sshll.u32 %s212_s19, 4  ;;  %s220_s25 = int_to_ptr.vmem [resolvable:$true] %s219_s25 }
  0x1e   : > { %s217_s26 = sshll.u32 %s215_s8, 4  ;;  %228 = sbr.rel (%p1058_p3) target bundleno = 220 (0xdc), region = 32  ;;  %s218_s26 = int_to_ptr.hbm [resolvable:$true] %s217_s26 }
  0x1f   : > { %p678_p4 = pnand %p677_p1, %p90_p8 }
  0x20   : > { %687 = dma.hbm_to_vmem [thread:$0]  (!%p1017_p6), %s218_s26, 16, %s220_s25, %s1021_s7  }
  0x21   : > { %680 = dma.hbm_to_vmem [thread:$0]  (!%p678_p4), %s170_s27, 384, %s172_s30, [#allocation4], %s931_s9, %s931_s9, %s932_s10  }
  0x23   : > { %895 = dma.done.wait (%p90_p8), [#allocation4], 384  }
  0x24   : > { %897 = vsyncadd (%p90_p8), [#allocation4], 4294966912  ;;  %s235_s23 = sand.u32 1, %s1029_s11   ;;  %s1086_s29 = sand.u32 1, %s912_s13  }
  0x25   : > { %s591_s4 = sshll.u32 %s1086_s29, 6  ;;  %s236_s9 = scalar_lea.sflag [#allocation7], %s235_s23 }
  0x26   : > { %s1089_s6 = scalar_lea.vmem [#allocation6], %s591_s4 }
  0x27   : > { %899 = dma.done.wait (%p1038_p11), %s236_s9, 1040  }
  0x28   : > { %901 = vsyncadd (%p1038_p11), %s236_s9, 4294966256  ;;  %v649_v0 = vld [vmem:[%s1089_s6 + $0x38] sm:$0xff]  ;;  %v648_v1 = vld [vmem:[%s1089_s6 + $0x30] sm:$0xff]  ;;  %s248_s7 = scalar_lea.vmem [#allocation8], %s1086_s29  ;;  %s666_s10 = smul.u32 48, %s1086_s29 }
  0x29   : > { %383 = vmatpush.bf16.msra.mxu0 %v649_v0  ;;  %650 = vmatpush.bf16.msra.mxu1 %v649_v0  ;;  %v647_v2 = vld [vmem:[%s1089_s6 + $0x28] sm:$0xff]  ;;  %v646_v3 = vld [vmem:[%s1089_s6 + $0x20] sm:$0xff]  ;;  %v645_v4 = vld [vmem:[%s1089_s6 + $0x18] sm:$0xff]  ;;  %s636_s20 = sshll.u32 %s920_s15, 3  ;;  %s445_s15 = scalar_lea.sflag [#allocation5], %s1086_s29 }
  0x2a   : > { %651 = vmatpush.bf16.msra.mxu2 %v649_v0  ;;  %v644_v5 = vld [vmem:[%s1089_s6 + $0x10] sm:$0xff]  ;;  %v643_v6 = vld [vmem:[%s1089_s6 + $0x8] sm:$0xff]  ;;  %v642_v7 = vld [vmem:[%s1089_s6] sm:$0xff]  ;;  %s275_s11 = scalar_lea.vmem [#allocation9], %s666_s10  ;;  %s458_s30 = scalar_lea.hbm %s1147_s3, %s636_s20 }
  0x2b   : > { %v639_v8 = vld [vmem:[#allocation3] sm:$0xff]  ;;  %v640_v9 = vld [vmem:[#allocation3 + $0x8] sm:$0xff]  ;;  %v641_v10 = vld [vmem:[#allocation3 + $0x10] sm:$0xff]  ;;  %s459_s5 = sshll.u32 %s275_s11, 4  ;;  %s461_s8 = sshll.u32 %s458_s30, 4  ;;  %s460_s5 = int_to_ptr.vmem [resolvable:$true] %s459_s5  ;;  %s462_s8 = int_to_ptr.hbm [resolvable:$true] %s461_s8 }
  0x2c   : > { %v751_v11 = vld [vmem:[%s248_s7] ss:$0 sm:$0xff]  ;;  %s856_s19 = sshra.s32 %s462_s8, 4  ;;  %s862_s4 = scalar_lea.hbm %s1147_s3, 144  ;;  %s857_s19 = int_to_ptr.hbm [resolvable:$true] %s856_s19 }
  0x2d   : > { %384 = vmatpush.bf16.msra.mxu0 %v648_v1  ;;  %652 = vmatpush.bf16.msra.mxu1 %v648_v1  ;;  %s858_s25 = scalar_lea.hbm %s857_s19, 48  ;;  %p863_p8 = scmp.lt.s32.totalorder %s857_s19, %s1147_s3 }
  0x2e   : > { %653 = vmatpush.bf16.msra.mxu2 %v648_v1  ;;  %p859_p5 = scmp.ne.s32.totalorder %s857_s19, %s858_s25  ;;  %p864_p9 = scmp.lt.s32.totalorder %s862_s4, %s858_s25 }
  0x30   : > { %p860_p6 = pnand %p859_p5, %p1046_p13  ;;  %p865_p10 = por %p864_p9, %p863_p8 }
  0x31   : > { %385 = vmatpush.bf16.msra.mxu0 %v647_v2  ;;  %654 = vmatpush.bf16.msra.mxu1 %v647_v2 }
  0x32   : > { %655 = vmatpush.bf16.msra.mxu2 %v647_v2  ;;  %p861_p7 = pneg %p860_p6 }
  0x34   : > { %p866_p11 = pnand %p865_p10, %p861_p7 }
  0x35   : > { %386 = vmatpush.bf16.msra.mxu0 %v646_v3  ;;  %656 = vmatpush.bf16.msra.mxu1 %v646_v3 }
  0x36   : > { %657 = vmatpush.bf16.msra.mxu2 %v646_v3 }
  0x39   : > { %387 = vmatpush.bf16.msra.mxu0 %v645_v4  ;;  %658 = vmatpush.bf16.msra.mxu1 %v645_v4 }
  0x3a   : > { %659 = vmatpush.bf16.msra.mxu2 %v645_v4 }
  0x3d   : > { %388 = vmatpush.bf16.msra.mxu0 %v644_v5  ;;  %660 = vmatpush.bf16.msra.mxu1 %v644_v5 }
  0x3e   : > { %661 = vmatpush.bf16.msra.mxu2 %v644_v5 }
  0x41   : > { %389 = vmatpush.bf16.msra.mxu0 %v643_v6  ;;  %662 = vmatpush.bf16.msra.mxu1 %v643_v6 }
  0x42   : > { %663 = vmatpush.bf16.msra.mxu2 %v643_v6 }
  0x45   : > { %390 = vmatpush.bf16.msra.mxu0 %v642_v7  ;;  %664 = vmatpush.bf16.msra.mxu1 %v642_v7 }
  0x46   : > { %665 = vmatpush.bf16.msra.mxu2 %v642_v7 }
  0x48   : > { %391 = vmatmul.bf16.vlgmr.msra.gmra.mxu0 %v639_v8  ;;  %396 = vmatmul.bf16.vlgmr.msra.gmra.mxu1 %v640_v9 }
  0x49   : > { %401 = vmatmul.bf16.vlgmr.msra.gmra.mxu2 %v641_v10 }
  0xc5   : > { %v392_v12 = vpop.f32.mrf.mxu0  ;;  %v397_v13 = vpop.f32.mrf.mxu1 }
  0xc6   : > { %v432_v14 = vadd.f32 %v751_v11, %v392_v12  ;;  %v434_v15 = vadd.f32 %v751_v11, %v397_v13 }
  0xc8   : > { %438 = vst [vmem:[%s275_s11] sm:$0xff] %v432_v14 }
  0xc9   : > { %440 = vst [vmem:[%s275_s11 + $0x10] sm:$0xff] %v434_v15 }
  0xcc   : > { %v402_v16 = vpop.f32.mrf.mxu2 }
  0xcd   : > { %v436_v17 = vadd.f32 %v751_v11, %v402_v16  ;;  %v394_v18 = vpop.f32.mrf.mxu0  ;;  %v399_v19 = vpop.f32.mrf.mxu1 }
  0xce   : > { %v433_v20 = vadd.f32 %v751_v11, %v394_v18  ;;  %v435_v21 = vadd.f32 %v751_v11, %v399_v19 }
  0xcf   : > { %442 = vst [vmem:[%s275_s11 + $0x20] sm:$0xff] %v436_v17 }
  0xd0   : > { %439 = vst [vmem:[%s275_s11 + $0x8] sm:$0xff] %v433_v20 }
  0xd1   : > { %441 = vst [vmem:[%s275_s11 + $0x18] sm:$0xff] %v435_v21 }
  0xd4   : > { %v404_v22 = vpop.f32.mrf.mxu2 }
  0xd5   : > { %v437_v23 = vadd.f32 %v751_v11, %v404_v22 }
  0xd7   : > { %443 = vst [vmem:[%s275_s11 + $0x28] sm:$0xff] %v437_v23 }
  0xd8   : > { %869 = shalt.err (!%p866_p11)
}
  0xd9   : > { %s934_s29 = smov 128   ;;  %s935_s7 = smov 384  }
  0xda   : > { %s936_s10 = smov 8  }
  0xdb   : > { %675 = dma.vmem_to_hbm [thread:$0]  (%p1046_p13), %s460_s5, 768, %s462_s8, %s445_s15, %s934_s29, %s935_s7, %s936_s10  }
  0xdc PF: > { %p695_p12 = scmp.ge.s32.totalorder %s928_s17, 2  ;;  %s476_s11 = sand.u32 1, %s908_s12  }
  0xdd   : > { %s477_s20 = scalar_lea.sflag [#allocation5], %s476_s11 }
  0xde   : > { %p689_p2 = pnand %p695_p12, %p1050_p0 }
  0xe0   : > { %p690_p3 = pneg %p689_p2 }
  0xe2   : > { %903 = dma.done.wait (%p690_p3), %s477_s20, 768  }
  0xe3   : > { %905 = vsyncadd (%p690_p3), %s477_s20, 4294966528  ;;  %s20_s17 = sadd.s32 1, %s928_s17   ;;  %s1154_s12 = smov %s912_s13 }
  0xe4   : > { %p17_p1 = scmp.ge.s32.totalorder %s20_s17, 5   ;;  %s1155_s13 = smov %s916_s14 }
  0xe5   : > { %s1156_s14 = smov %s1007_s24  ;;  %s1157_s15 = smov %s924_s16 }
  0xe6   : > { %s1158_s16 = smov %s1160_s18  ;;  %19 = sbr.rel (!%p17_p1) target bundleno = 7 (0x7), region = 102 }
  0xeb   :  { %483 = vsyncpa [#allocation4], 1 }
  0xec   :  { %485 = vsyncpa [#allocation4 + $0x1], 1 }
  0xed   :  { %486 = vsyncpa [#allocation7], 1 }
  0xee   :  { %488 = vsyncpa [#allocation7 + $0x1], 1 }
  0xef   :  { %489 = vsyncpa [#allocation5], 1 }
  0xf0   :  { %491 = vsyncpa [#allocation5 + $0x1], 1 }

</bundles_post_ra>
